<compile_context>
chip_gen: v5e
topology: v5e:2x2
jax: 0.10.0
libtpu: 0.0.40
codegen_flags: <defaults>
</compile_context>

<pallas_src>
import math
import jax
import jax.numpy as jnp
from jax.experimental import pallas as pl
from jax.experimental.pallas import tpu as pltpu


def _round_up(x, m):
    return ((x + m - 1) // m) * m


def _make_conv_matmul_kernel(has_bias, weight_resident, tn, tk):
    """Builds the tile kernel.

    Refs (in order):
      x_ref:   (tm, tk)                 activations (compute dtype)
      w_ref:   (tk, tn) or (Kp, Np)     weight tile / full resident weight
      b_ref:   (1, tn)  f32             only when has_bias
      o_ref:   (tm, tn)                 output tile
      acc_ref: (tm, tn) f32             accumulator, persists across K axis
    """
    def kernel(*refs):
        if has_bias:
            x_ref, w_ref, b_ref, o_ref, acc_ref = refs
        else:
            x_ref, w_ref, o_ref, acc_ref = refs
            b_ref = None

        k = pl.program_id(2)

        @pl.when(k == 0)
        def _():
            acc_ref[...] = jnp.zeros_like(acc_ref)

        if weight_resident:
            j = pl.program_id(1)
            w_blk = w_ref[pl.ds(pl.multiple_of(k * tk, tk), tk),
                          pl.ds(pl.multiple_of(j * tn, tn), tn)]
        else:
            w_blk = w_ref[...]

        acc_ref[...] += jax.lax.dot_general(
            x_ref[...], w_blk,
            dimension_numbers=(((1,), (0,)), ((), ())),   # (tm,tk)@(tk,tn)
            preferred_element_type=jnp.float32)

        @pl.when(k == pl.num_programs(2) - 1)
        def _():
            out = acc_ref[...]
            if has_bias:
                out = out + b_ref[...]
            o_ref[...] = out.astype(o_ref.dtype)

    return kernel


def _im2col(x, kernel_size, stride, padding, dilation):
    """x: (B, T, C) -> (B, T_out, kernel_size * C) with tap-major ordering."""
    B, T, C = x.shape
    if padding > 0:
        x = jnp.pad(x, ((0, 0), (padding, padding), (0, 0)))
    T_pad = T + 2 * padding
    T_out = (T_pad - dilation * (kernel_size - 1) - 1) // stride + 1
    if kernel_size == 1:
        # Pointwise conv (module default): no unfold copy needed.
        if stride > 1:
            sl = x[:, :(T_out - 1) * stride + 1:stride, :]
        else:
            sl = x[:, :T_out, :]
        return sl, T_out
    # TODO(synk): for kernel_size > 1 the unfold is still materialized in HBM
    # (~K x activation traffic); an in-kernel unfold with the tap index as a
    # reduction grid axis over the padded input would remove that.
    taps = []
    for k in range(kernel_size):
        start = k * dilation
        sl = jax.lax.slice_in_dim(x, start, start + (T_out - 1) * stride + 1, axis=1)
        if stride > 1:
            sl = sl[:, ::stride, :]
        taps.append(sl)                                   # (B, T_out, C)
    cols = jnp.stack(taps, axis=2)                        # (B, T_out, K, C)
    return cols.reshape(B, T_out, kernel_size * C), T_out


def conv_forward(x, weight, bias=None, *, stride=1, padding=0, dilation=1,
                 tm=512, tn=512, tk=512,
                 compute_dtype=jnp.bfloat16, out_dtype=None,
                 vmem_limit_bytes=48 * 1024 * 1024,
                 weight_resident_bytes=4 * 1024 * 1024):
    """Channel-last Conv1d forward (matches the PyTorch Conv module).

    x:      (B, T, C_in)
    weight: (C_out, C_in, K)   -- PyTorch nn.Conv1d convention
    bias:   (C_out,) or None
    """
    B, T, C_in = x.shape
    C_out, C_in_w, K = weight.shape
    assert C_in_w == C_in, "weight/in_channels mismatch"
    out_dtype = out_dtype or x.dtype

    cols, T_out = _im2col(x, K, stride, padding, dilation)
    M, Kdim, N = B * T_out, K * C_in, C_out

    # MXU-friendly operand dtypes (f32 accumulation happens inside the kernel).
    x2d = cols.reshape(M, Kdim).astype(compute_dtype)
    # One-time transpose of the small weight to (K*C_in, C_out), tap-major rows
    # matching the im2col column order -> plain (tm,tk)@(tk,tn) contraction.
    w2d = jnp.transpose(weight, (2, 1, 0)).reshape(Kdim, N).astype(compute_dtype)

    # Tile sizes: multiples of 8 (sublane) for M, 128 (lane) for N and K; clamp
    # to the padded problem so tiny shapes don't over-pad.
    tm = min(tm, _round_up(M, 8))
    tn = min(tn, _round_up(N, 128))
    tk = min(tk, _round_up(Kdim, 128))
    Mp, Np, Kp = _round_up(M, tm), _round_up(N, tn), _round_up(Kdim, tk)

    # v7x megacore: prefer >= 2 parallel (i, j) blocks so both TensorCores work.
    if (Mp // tm) * (Np // tn) < 2 and M > 8:
        half_m = _round_up((M + 1) // 2, 8)
        if half_m < tm:
            tm = half_m
            Mp = _round_up(M, tm)

    x2d = jnp.pad(x2d, ((0, Mp - M), (0, Kp - Kdim)))
    w2d = jnp.pad(w2d, ((0, Kp - Kdim), (0, Np - N)))

    itemsize = jnp.dtype(compute_dtype).itemsize
    has_bias = bias is not None
    # Keep the (small) weight fully resident in VMEM: one HBM fetch total
    # instead of one per M-sweep.
    weight_resident = (Kp * Np * itemsize) <= weight_resident_bytes

    operands = [x2d, w2d]
    in_specs = [pl.BlockSpec((tm, tk), lambda i, j, k: (i, k))]      # activations
    if weight_resident:
        in_specs.append(pl.BlockSpec((Kp, Np), lambda i, j, k: (0, 0)))
    else:
        in_specs.append(pl.BlockSpec((tk, tn), lambda i, j, k: (k, j)))
    if has_bias:
        b2d = jnp.pad(bias.astype(jnp.float32), (0, Np - N)).reshape(1, Np)
        operands.append(b2d)
        in_specs.append(pl.BlockSpec((1, tn), lambda i, j, k: (0, j)))

    grid = (Mp // tm, Np // tn, Kp // tk)
    flops = 2 * Mp * Kp * Np
    bytes_accessed = (itemsize * (Mp * Kp + Kp * Np)
                      + jnp.dtype(out_dtype).itemsize * Mp * Np
                      + (4 * Np if has_bias else 0))

    kernel = _make_conv_matmul_kernel(has_bias, weight_resident, tn, tk)
    out = pl.pallas_call(
        kernel,
        out_shape=jax.ShapeDtypeStruct((Mp, Np), out_dtype),
        grid_spec=pltpu.PrefetchScalarGridSpec(
            num_scalar_prefetch=0,
            grid=grid,
            in_specs=in_specs,
            out_specs=pl.BlockSpec((tm, tn), lambda i, j, k: (i, j)),
            scratch_shapes=[pltpu.VMEM((tm, tn), jnp.float32)],
        ),
        compiler_params=pltpu.CompilerParams(
            dimension_semantics=("parallel", "parallel", "arbitrary"),
            vmem_limit_bytes=vmem_limit_bytes,
        ),
        cost_estimate=pl.CostEstimate(
            flops=flops, transcendentals=0, bytes_accessed=int(bytes_accessed)),
    )(*operands)

    return out[:M, :N].reshape(B, T_out, C_out)


def init_conv_params(key, in_channels, out_channels, kernel_size=1, w_init="linear"):
    """xavier_uniform weight (gain('linear')==1) + PyTorch conv default bias init."""
    gain = 1.0
    kw, kb = jax.random.split(key)
    fan_in = in_channels * kernel_size
    fan_out = out_channels * kernel_size
    limit = gain * math.sqrt(6.0 / (fan_in + fan_out))
    weight = jax.random.uniform(kw, (out_channels, in_channels, kernel_size),
                                jnp.float32, minval=-limit, maxval=limit)
    b_limit = 1.0 / math.sqrt(fan_in)
    bias = jax.random.uniform(kb, (out_channels,), jnp.float32,
                              minval=-b_limit, maxval=b_limit)
    return weight, bias


def _conv_ref(x, weight, bias, stride, padding, dilation):
    y = jax.lax.conv_general_dilated(
        x, weight,
        window_strides=(stride,),
        padding=[(padding, padding)],
        rhs_dilation=(dilation,),
        dimension_numbers=("NWC", "OIW", "NWC"),
        precision=jax.lax.Precision.HIGHEST)
    if bias is not None:
        y = y + bias[None, None, :]
    return y


if __name__ == "__main__":
    key = jax.random.PRNGKey(0)
    k_x, k_p1, k_p3 = jax.random.split(key, 3)

    batch, seq, in_ch, out_ch = 2, 8, 32, 64
    x = jax.random.normal(k_x, (batch, seq, in_ch), jnp.float32)

    # Case 1: module defaults (kernel_size=1, stride=1, padding=0) — pointwise
    # conv on the default bf16 MXU path (loose tolerance vs f32 reference).
    w1, b1 = init_conv_params(k_p1, in_ch, out_ch, kernel_size=1)
    y1 = jax.block_until_ready(conv_forward(x, w1, b1))
    y1_ref = _conv_ref(x, w1, b1, stride=1, padding=0, dilation=1)
    assert y1.shape == (batch, seq, out_ch)
    assert jnp.allclose(y1, y1_ref, atol=3e-2, rtol=3e-2), "case1 (bf16) mismatch"

    # Case 1b: f32 compute path, tight tolerance (checks kernel structure exactly).
    y1f = jax.block_until_ready(conv_forward(x, w1, b1, compute_dtype=jnp.float32))
    assert jnp.allclose(y1f, y1_ref, atol=1e-4, rtol=1e-4), "case1 (f32) mismatch"

    # Case 2: kernel_size=3, padding=1 ("same" length) — exercises the im2col path.
    w3, b3 = init_conv_params(k_p3, in_ch, out_ch, kernel_size=3)
    y3 = jax.block_until_ready(conv_forward(x, w3, b3, padding=1))
    y3_ref = _conv_ref(x, w3, b3, stride=1, padding=1, dilation=1)
    assert y3.shape == (batch, seq, out_ch)
    assert jnp.allclose(y3, y3_ref, atol=3e-2, rtol=3e-2), "case2 mismatch"

    # Case 3: stride=2, padding=1, no bias — exercises the bias-less kernel variant.
    y3s = jax.block_until_ready(conv_forward(x, w3, None, stride=2, padding=1))
    y3s_ref = _conv_ref(x, w3, None, stride=2, padding=1, dilation=1)
    assert y3s.shape == y3s_ref.shape
    assert jnp.allclose(y3s, y3s_ref, atol=3e-2, rtol=3e-2), "case3 mismatch"

    print("KERNEL_OK")
</pallas_src>

<mosaic_0001>
module attributes {stable_mosaic.version = 11 : i64} {
  func.func @kernel(%arg0: i32, %arg1: i32, %arg2: i32, %arg3: memref<8x128xbf16, #tpu.memory_space<vmem>>, %arg4: memref<128x128xbf16, #tpu.memory_space<vmem>>, %arg5: memref<1x128xf32, #tpu.memory_space<vmem>>, %arg6: memref<8x128xf32, #tpu.memory_space<vmem>>, %arg7: memref<8x128xf32, #tpu.memory_space<vmem>>) attributes {dimension_semantics = [#tpu.dimension_semantics<parallel>, #tpu.dimension_semantics<parallel>, #tpu.dimension_semantics<arbitrary>], iteration_bounds = array<i64: 2, 1, 1>, scalar_prefetch = 0 : i64, scratch_operands = 1 : i64, tpu.core_type = #tpu.core_type<tc>, window_params = [{transform_indices = @transform_0, window_bounds = array<i64: 8, 128>}, {pipeline_mode = #tpu.pipeline_mode<synchronous>, transform_indices = @transform_1, window_bounds = array<i64: 128, 128>}, {transform_indices = @transform_2, window_bounds = array<i64: 1, 128>}, {transform_indices = @transform_3, window_bounds = array<i64: 8, 128>}]} {
    %c0_i32 = arith.constant 0 : i32
    %0 = arith.cmpi eq, %arg2, %c0_i32 : i32
    %1 = arith.extui %0 : i1 to i32
    %c0_i32_0 = arith.constant 0 : i32
    %2 = arith.cmpi ne, %1, %c0_i32_0 : i32
    scf.if %2 {
      %cst_9 = arith.constant 0.000000e+00 : f32
      %18 = vector.broadcast %cst_9 : f32 to vector<8x128xf32>
      %c0_10 = arith.constant 0 : index
      %c0_11 = arith.constant 0 : index
      %19 = vector.load %arg7[%c0_10, %c0_11] : memref<8x128xf32, #tpu.memory_space<vmem>>, vector<8x128xf32>
      tpu.vector_store %arg7[%c0_10, %c0_11], %18 {strides = array<i32>} : memref<8x128xf32, #tpu.memory_space<vmem>>, vector<8x128xf32>,
    } else {
    }
    %c128_i32 = arith.constant 128 : i32
    %3 = arith.muli %arg2, %c128_i32 : i32
    %4 = tpu.assume_multiple %3, 128 : i32
    %c128_i32_1 = arith.constant 128 : i32
    %5 = arith.muli %arg1, %c128_i32_1 : i32
    %6 = tpu.assume_multiple %5, 128 : i32
    %7 = arith.index_cast %4 : i32 to index
    %8 = arith.index_cast %6 : i32 to index
    %9 = vector.load %arg4[%7, %8] : memref<128x128xbf16, #tpu.memory_space<vmem>>, vector<128x128xbf16>
    %c0 = arith.constant 0 : index
    %c0_2 = arith.constant 0 : index
    %10 = vector.load %arg7[%c0, %c0_2] : memref<8x128xf32, #tpu.memory_space<vmem>>, vector<8x128xf32>
    %c0_3 = arith.constant 0 : index
    %c0_4 = arith.constant 0 : index
    %11 = vector.load %arg3[%c0_3, %c0_4] : memref<8x128xbf16, #tpu.memory_space<vmem>>, vector<8x128xbf16>
    %cst = arith.constant dense<0.000000e+00> : vector<8x128xf32>
    %12 = tpu.matmul %11, %9, %cst {dimension_numbers = #tpu.dot_dimension_numbers<[1], [0], [0], [1], [0, 0, 1, 1], [], []>} : vector<8x128xbf16>, vector<128x128xbf16>, vector<8x128xf32> -> vector<8x128xf32>
    %13 = arith.addf %10, %12 : vector<8x128xf32>
    %c0_5 = arith.constant 0 : index
    %c0_6 = arith.constant 0 : index
    %14 = vector.load %arg7[%c0_5, %c0_6] : memref<8x128xf32, #tpu.memory_space<vmem>>, vector<8x128xf32>
    tpu.vector_store %arg7[%c0_5, %c0_6], %13 {strides = array<i32>} : memref<8x128xf32, #tpu.memory_space<vmem>>, vector<8x128xf32>,
    %c0_i32_7 = arith.constant 0 : i32
    %15 = arith.cmpi eq, %arg2, %c0_i32_7 : i32
    %16 = arith.extui %15 : i1 to i32
    %c0_i32_8 = arith.constant 0 : i32
    %17 = arith.cmpi ne, %16, %c0_i32_8 : i32
    scf.if %17 {
      %c0_9 = arith.constant 0 : index
      %c0_10 = arith.constant 0 : index
      %18 = vector.load %arg7[%c0_9, %c0_10] : memref<8x128xf32, #tpu.memory_space<vmem>>, vector<8x128xf32>
      %c0_11 = arith.constant 0 : index
      %c0_12 = arith.constant 0 : index
      %19 = vector.load %arg5[%c0_11, %c0_12] : memref<1x128xf32, #tpu.memory_space<vmem>>, vector<1x128xf32>
      %20 = vector.broadcast %19 : vector<1x128xf32> to vector<8x128xf32>
      %21 = arith.addf %18, %20 : vector<8x128xf32>
      %c0_13 = arith.constant 0 : index
      %c0_14 = arith.constant 0 : index
      %22 = vector.load %arg6[%c0_13, %c0_14] : memref<8x128xf32, #tpu.memory_space<vmem>>, vector<8x128xf32>
      tpu.vector_store %arg6[%c0_13, %c0_14], %21 {strides = array<i32>} : memref<8x128xf32, #tpu.memory_space<vmem>>, vector<8x128xf32>,
    } else {
    }
    return
  }
  func.func @transform_0(%arg0: i32, %arg1: i32, %arg2: i32) -> (i32, i32) {
    %c0_i32 = arith.constant 0 : i32
    return %arg0, %arg2 : i32, i32
  }
  func.func @transform_1(%arg0: i32, %arg1: i32, %arg2: i32) -> (i32, i32) {
    %c0_i32 = arith.constant 0 : i32
    %c0_i32_0 = arith.constant 0 : i32
    %c0_i32_1 = arith.constant 0 : i32
    return %c0_i32, %c0_i32_0 : i32, i32
  }
  func.func @transform_2(%arg0: i32, %arg1: i32, %arg2: i32) -> (i32, i32) {
    %c0_i32 = arith.constant 0 : i32
    %c0_i32_0 = arith.constant 0 : i32
    return %c0_i32, %arg1 : i32, i32
  }
  func.func @transform_3(%arg0: i32, %arg1: i32, %arg2: i32) -> (i32, i32) {
    %c0_i32 = arith.constant 0 : i32
    return %arg0, %arg1 : i32, i32
  }
}

</mosaic_0001>

<bundles_post_ra>
// kernel: tpu_custom_call.1
= control target key start
LH: loop header
LB: loop body
LE: loop exit
PB: predicated region body
PF: predicated region fallthrough
CT: control target
= control target key end

     0   :  { %8 = vsyncpa [#allocation4], 0  ;;  %s923_s0 = inlined_call_operand.hbm [shape: bf16[16,128], index: 0, kind: input, shape index: {}]   ;;  %s924_s1 = inlined_call_operand.hbm [shape: bf16[128,128], index: 1, kind: input, shape index: {}]   ;;  %s925_s2 = inlined_call_operand.vmem [shape: f32[1,128], index: 2, kind: input, shape index: {}]   ;;  %s926_s3 = inlined_call_operand.hbm [shape: f32[16,128], index: 3, kind: output, shape index: {}]  }
   0x1   :  { %10 = vsyncpa [#allocation4 + $0x1], 0 }
   0x2   :  { %11 = vsyncpa [#allocation7], 0 }
   0x3   :  { %12 = vsyncpa [#allocation5], 0 }
   0x4   :  { %14 = vsyncpa [#allocation5 + $0x1], 0  ;;  %s776_s12 = smov 0   ;;  %s778_s13 = smov 0  }
   0x5   :  { %s780_s14 = smov 0   ;;  %s782_s15 = smov 0  }
   0x6   :  { %s784_s16 = smov 0   ;;  %s786_s17 = smov 0  }
   0x7 LB: > { %s473_s18 = sadd.s32 4294967295, %s751_s17   ;;  %p475_p0 = scmp.ge.s32.totalorder %s751_s17, 1  ;;  %s751_s17 = sphi %s786_s17, %s20_s17   ;;  %s747_s16 = sphi %s784_s16, %s937_s16   ;;  %s743_s15 = sphi %s782_s15, %s936_s15   ;;  %s739_s14 = sphi %s780_s14, %s935_s14   ;;  %s735_s13 = sphi %s778_s13, %s934_s13   ;;  %s731_s12 = sphi %s776_s12, %s933_s12  }
   0x8   : > { %p808_p1 = scmp.eq.s32.totalorder %s473_s18, 0  ;;  %p147_p2 = scmp.lt.s32.totalorder %s751_s17, 3 }
   0x9   : > { %s158_s22 = sshll.u32 %s924_s1, 4  ;;  %s753_s24 = smov [#allocation6]   ;;  %s159_s22 = int_to_ptr.hbm [resolvable:$true] %s158_s22 }
   0xa   : > { %p816_p3 = pnand %p475_p0, %p147_p2  ;;  %s160_s25 = sshll.u32 %s753_s24, 4  ;;  %s161_s25 = int_to_ptr.vmem [resolvable:$true] %s160_s25 }
   0xb   : > { %p478_p6 = scmp.ge.s32.totalorder %s751_s17, 2  ;;  %s754_s26 = smov 64  }
   0xc   : > { %p537_p4 = pneg %p816_p3  ;;  %s755_s27 = smov 4  }
   0xd   : > { %s474_s28 = sadd.s32 4294967294, %s751_s17   ;;  %s39_s29 = sadd.s32 1, %s747_s16 }
   0xe   : > { %p538_p5 = pnand %p537_p4, %p808_p1  ;;  %s48_s30 = sadd.s32 1, %s739_s14 }
   0xf   : > { %p41_p7 = scmp.ge.s32.totalorder %s39_s29, 2  ;;  %p55_p8 = scmp.ne.s32.totalorder %s739_s14, %s735_s13 }
  0x10   : > { %540 = dma.hbm_to_vmem [thread:$0]  (!%p538_p5), %s159_s22, 1024, %s161_s25, [#allocation7], %s754_s26, %s754_s26, %s755_s27  }
  0x11   : > { %p56_p9 = scmp.eq.s32.totalorder %s751_s17, 0  ;;  %p61_p10 = scmp.ne.s32.totalorder %s735_s13, %s731_s12 }
  0x12   : > { %s939_s29 = smov (%p41_p7, %s39_s29), 0  ;;  %p134_p13 = scmp.eq.s32.totalorder %s473_s18, 1 }
  0x13   : > { %p835_p11 = por %p56_p9, %p55_p8  ;;  %p841_p12 = por %p808_p1, %p61_p10 }
  0x14   : > { %s43_s6 = ssub.s32 %s747_s16, %s939_s29  ;;  %p140_p2 = scmp.eq.s32.totalorder %s474_s28, 1 }
  0x15   : > { %p46_p0 = scmp.eq.s32.totalorder %s43_s6, 0  ;;  %p847_p4 = por %p134_p13, %p55_p8 }
  0x16   : > { %p550_p5 = scmp.lt.s32.totalorder %s751_s17, 2  ;;  %p855_p7 = por %p140_p2, %p61_p10 }
  0x17   : > { %s853_s8 = scalar_select %p46_p0, %s739_s14, %s48_s30  }
  0x18   : > { %s180_s10 = sand.u32 1, %s739_s14   ;;  %s480_s20 = sshll.u32 %s747_s16, 2 }
  0x19   : > { %s479_s11 = sshll.u32 %s180_s10, 2  ;;  %s189_s18 = scalar_lea.hbm %s923_s0, %s480_s20 }
  0x1a   : > { %s184_s24 = scalar_lea.vmem [#allocation3], %s479_s11  ;;  %s191_s26 = sshll.u32 %s189_s18, 4  ;;  %s192_s26 = int_to_ptr.hbm [resolvable:$true] %s191_s26 }
  0x1b   : > { %s193_s25 = sshll.u32 %s184_s24, 4  ;;  %p542_p8 = pnand %p550_p5, %p835_p11  ;;  %s194_s25 = int_to_ptr.vmem [resolvable:$true] %s193_s25 }
  0x1c   : > { %s181_s27 = scalar_lea.sflag [#allocation4], %s180_s10  ;;  %202 = sbr.rel (%p816_p3) target bundleno = 202 (0xca), region = 32 }
  0x1d   : > { %544 = dma.hbm_to_vmem [thread:$0]  (!%p542_p8), %s192_s26, 64, %s194_s25, %s181_s27  }
  0x1e   : > { %s869_s28 = sand.u32 (!%p816_p3), 1, %s735_s13  }
  0x1f   : > { %s482_s30 = sshll.u32 (!%p816_p3), %s869_s28, 2  ;;  %s205_s6 = scalar_lea.sflag (!%p816_p3), [#allocation4], %s869_s28 }
  0x20   : > { %s208_s11 = scalar_lea.vmem (!%p816_p3), [#allocation3], %s482_s30 }
  0x21   : > { %718 = dma.done.wait (%p841_p12), %s205_s6, 64  }
  0x22   : > { %720 = vsyncadd (%p841_p12), %s205_s6, 4294967232 }
  0x23   : > { %722 = dma.done.wait (%p808_p1), [#allocation7], 1024  }
  0x24   : > { %724 = vsyncadd (%p808_p1), [#allocation7], 4294966272  ;;  %v528_v0 = vld [vmem:[#allocation6 + $0x38] sm:$0xff]  ;;  %v527_v1 = vld [vmem:[#allocation6 + $0x30] sm:$0xff]  ;;  %s518_s19 = sshll.u32 %s743_s15, 3  ;;  %s484_s23 = sshll.u32 %s869_s28, 3 }
  0x25   : > { %323 = vmatpush.bf16.msra.mxu0 %v528_v0  ;;  %v526_v2 = vld [vmem:[#allocation6 + $0x28] sm:$0xff]  ;;  %v525_v3 = vld [vmem:[#allocation6 + $0x20] sm:$0xff]  ;;  %v524_v4 = vld [vmem:[#allocation6 + $0x18] sm:$0xff]  ;;  %s360_s10 = scalar_lea.hbm %s926_s3, %s518_s19  ;;  %s239_s22 = scalar_lea.vmem [#allocation8], %s484_s23 }
  0x26   : > { %v523_v5 = vld [vmem:[#allocation6 + $0x10] sm:$0xff]  ;;  %v522_v6 = vld [vmem:[#allocation6 + $0x8] sm:$0xff]  ;;  %v521_v7 = vld [vmem:[#allocation6] sm:$0xff]  ;;  %s362_s18 = sshll.u32 %s239_s22, 4  ;;  %s364_s24 = sshll.u32 %s360_s10, 4  ;;  %s363_s18 = int_to_ptr.vmem [resolvable:$true] %s362_s18  ;;  %s365_s24 = int_to_ptr.hbm [resolvable:$true] %s364_s24 }
  0x27   : > { %v274_v8 = vld [vmem:[%s208_s11] sm:$0xf]  ;;  %s349_s25 = scalar_lea.sflag [#allocation5], %s869_s28  ;;  %s679_s15 = sshra.s32 %s365_s24, 4  ;;  %s680_s15 = int_to_ptr.hbm [resolvable:$true] %s679_s15 }
  0x28   : > { %v604_v9 = vld [vmem:[%s925_s2] ss:$0 sm:$0xff]  ;;  %s681_s26 = scalar_lea.hbm %s680_s15, 8  ;;  %s685_s6 = scalar_lea.hbm %s926_s3, 16 }
  0x29   : > { %324 = vmatpush.bf16.msra.mxu0 %v527_v1  ;;  %p682_p1 = scmp.ne.s32.totalorder %s680_s15, %s681_s26  ;;  %p686_p10 = scmp.lt.s32.totalorder %s680_s15, %s926_s3 }
  0x2a   : > { %p687_p11 = scmp.lt.s32.totalorder %s685_s6, %s681_s26 }
  0x2b   : > { %p683_p3 = pnand %p682_p1, %p847_p4 }
  0x2c   : > { %p688_p12 = por %p687_p11, %p686_p10 }
  0x2d   : > { %325 = vmatpush.bf16.msra.mxu0 %v526_v2  ;;  %p684_p9 = pneg %p683_p3 }
  0x2f   : > { %p689_p13 = pnand %p688_p12, %p684_p9 }
  0x31   : > { %326 = vmatpush.bf16.msra.mxu0 %v525_v3 }
  0x35   : > { %327 = vmatpush.bf16.msra.mxu0 %v524_v4 }
  0x39   : > { %328 = vmatpush.bf16.msra.mxu0 %v523_v5 }
  0x3d   : > { %329 = vmatpush.bf16.msra.mxu0 %v522_v6 }
  0x41   : > { %330 = vmatpush.bf16.msra.mxu0 %v521_v7 }
  0x44   : > { %331 = vmatmul.bf16.vlgmr.msra.gmra.mxu0 %v274_v8 }
  0xc1   : > { %v332_v10 = vpop.f32.mrf.mxu0 }
  0xc2   : > { %v346_v11 = vadd.f32 %v604_v9, %v332_v10 }
  0xc4   : > { %347 = vst [vmem:[%s239_s22] sm:$0xff] %v346_v11 }
  0xc5   : > { %692 = shalt.err (!%p689_p13)
}
  0xc6   : > { %535 = dma.vmem_to_hbm [thread:$0]  (%p847_p4), %s363_s18, 128, %s365_s24, %s349_s25  }
  0xc9   : > { %v334_v12 = vpop.f32.mrf.mxu0 }
  0xca PF: > { %s376_s28 = sand.u32 1, %s731_s12   ;;  %p546_p0 = pnand %p478_p6, %p855_p7 }
  0xcb   : > { %s377_s23 = scalar_lea.sflag [#allocation5], %s376_s28 }
  0xcc   : > { %p547_p2 = pneg %p546_p0 }
  0xce   : > { %726 = dma.done.wait (%p547_p2), %s377_s23, 128  }
  0xcf   : > { %728 = vsyncadd (%p547_p2), %s377_s23, 4294967168  ;;  %s20_s17 = sadd.s32 1, %s751_s17   ;;  %s933_s12 = smov %s735_s13 }
  0xd0   : > { %p17_p5 = scmp.ge.s32.totalorder %s20_s17, 4   ;;  %s934_s13 = smov %s739_s14 }
  0xd1   : > { %s935_s14 = smov %s853_s8  ;;  %s936_s15 = smov %s747_s16 }
  0xd2   : > { %s937_s16 = smov %s939_s29  ;;  %19 = sbr.rel (!%p17_p5) target bundleno = 7 (0x7), region = 93 }
  0xd7   :  { %383 = vsyncpa [#allocation4], 1 }
  0xd8   :  { %385 = vsyncpa [#allocation4 + $0x1], 1 }
  0xd9   :  { %386 = vsyncpa [#allocation7], 1 }
  0xda   :  { %387 = vsyncpa [#allocation5], 1 }
  0xdb   :  { %389 = vsyncpa [#allocation5 + $0x1], 1 }

</bundles_post_ra>
